<compile_context>
chip_gen: v6e
topology: v6e:2x2x1
jax: 0.10.0
libtpu: 0.0.40
codegen_flags: <defaults>
</compile_context>

<pallas_src>
import jax
import jax.numpy as jnp
from jax.experimental import pallas as pl
from jax.experimental.pallas import tpu as pltpu


def _rope_kernel(x_ref, coef_ref, o_ref):
    # x_ref / o_ref: (tM, D); coef_ref: (3, D) f32 = [A, B_next, B_prev].
    x = x_ref[...].astype(jnp.float32)
    d = x.shape[-1]
    a = coef_ref[0:1, :]        # (1, D) broadcasts over (tM, D)
    b_next = coef_ref[1:2, :]   # -c1 on even lanes, 0 on odd (also masks roll wrap)
    b_prev = coef_ref[2:3, :]   # +c1 on odd lanes, 0 on even (also masks roll wrap)

    nxt = pltpu.roll(x, shift=d - 1, axis=1)   # nxt[:, i] = x[:, (i + 1) % d]
    prv = pltpu.roll(x, shift=1, axis=1)       # prv[:, i] = x[:, (i - 1) % d]

    o_ref[...] = (x * a + nxt * b_next + prv * b_prev).astype(o_ref.dtype)


def _row_tile(n_rows, row_bytes, byte_budget=2 << 20, min_steps=8):
    """Pick a row-tile size: multiple of 8, <= ~2 MiB per tile, and (when the
    problem is big enough) at least `min_steps` grid steps for DMA overlap and
    v7x dual-TensorCore sharding."""
    cap = max(8, (byte_budget // row_bytes) // 8 * 8)          # VMEM safety cap
    if n_rows >= 8 * min_steps:
        split = max(8, (n_rows // min_steps) // 8 * 8)         # >= min_steps steps
    else:
        split = 8
    return max(8, min(cap, split))


class RoPE:
    def __init__(self, dim, base=10000, max_seq_len=256):
        self.dim = dim
        # Deterministic buffer, identical to the PyTorch __init__.
        inv_freq = 1.0 / (base ** (jnp.arange(0, dim, 2, dtype=jnp.float32) / dim))
        position = jnp.arange(max_seq_len, dtype=jnp.float32)
        sinusoid = position[:, None] * inv_freq[None, :]             # (max_seq_len, dim//2)
        self.emb = jnp.concatenate(
            [jnp.sin(sinusoid), jnp.cos(sinusoid)], axis=-1)         # (max_seq_len, dim)
        # Cache the interleaved coefficient table for the default position_ids
        # (it only depends on the rotation-pair index, not on batch/sequence).
        self._default_coef = self._build_coef(jnp.arange(dim // 2))

    def _build_coef(self, position_ids):
        D = self.dim
        rot_mat = self.emb[position_ids]                             # (S, D)
        # Reference forward broadcasts rot_mat[..., 0] (shape (S,)) against the
        # pair axis of size D//2 -> requires S == D//2, as in the original.
        assert rot_mat.shape[0] == D // 2, "reference broadcast requires len(position_ids) == dim // 2"
        c0 = rot_mat[:, 0]                                           # multiplies pair i
        c1 = rot_mat[:, 1]
        zero = jnp.zeros_like(c1)
        a = jnp.stack([c0, c0], axis=-1).reshape(1, D)               # A[2i]=A[2i+1]=c0[i]
        b_next = jnp.stack([-c1, zero], axis=-1).reshape(1, D)       # -c1 on even lanes
        b_prev = jnp.stack([zero, c1], axis=-1).reshape(1, D)        # +c1 on odd lanes
        return jnp.concatenate([a, b_next, b_prev], axis=0).astype(jnp.float32)  # (3, D)

    def __call__(self, x, position_ids=None):
        B, S, D = x.shape
        assert D == self.dim
        if position_ids is None:
            assert S == D // 2, "reference broadcast requires seq_len == dim // 2"
            coef = self._default_coef
        else:
            coef = self._build_coef(position_ids)

        # Flatten (B, S) -> rows: the coefficients depend only on the feature
        # (pair) index, so every row uses the same (3, D) table.
        M = B * S
        x_flat = x.reshape(M, D)
        row_bytes = D * jnp.dtype(x.dtype).itemsize
        tM = _row_tile(M, row_bytes)
        grid = (pl.cdiv(M, tM),)

        out_flat = pl.pallas_call(
            _rope_kernel,
            out_shape=jax.ShapeDtypeStruct((M, D), x.dtype),
            grid=grid,
            in_specs=[
                pl.BlockSpec((tM, D), lambda i: (i, 0)),   # x rows (lane-dense)
                pl.BlockSpec((3, D), lambda i: (0, 0)),    # coefficient table
            ],
            out_specs=pl.BlockSpec((tM, D), lambda i: (i, 0)),
            compiler_params=pltpu.CompilerParams(
                dimension_semantics=("parallel",)),
        )(x_flat, coef)

        # PyTorch forward returns shape (B, S, D//2, 2); same data order.
        return out_flat.reshape(B, S, D // 2, 2)


if __name__ == "__main__":
    # Small shapes consistent with the module: seq_len == dim // 2
    # (original was dim=512 / seq=256 / batch=4, scaled down).
    dim = 256
    seq_len = dim // 2     # 128
    batch = 2

    rope = RoPE(dim)       # base=10000, max_seq_len=256

    key = jax.random.PRNGKey(0)
    x = jax.random.normal(key, (batch, seq_len, dim), dtype=jnp.float32)

    out = rope(x)
    jax.block_until_ready(out)

    # Pure-JAX reference of the exact PyTorch forward semantics.
    rot_mat = rope.emb[jnp.arange(seq_len)]
    xp = x.reshape(batch, seq_len, dim // 2, 2)
    ref = jnp.stack(
        [xp[..., 0] * rot_mat[..., 0] - xp[..., 1] * rot_mat[..., 1],
         xp[..., 0] * rot_mat[..., 1] + xp[..., 1] * rot_mat[..., 0]],
        axis=-1,
    )

    assert out.shape == (batch, seq_len, dim // 2, 2)
    assert out.dtype == x.dtype
    assert jnp.allclose(out, ref, atol=1e-5, rtol=1e-5)
    print("KERNEL_OK")
</pallas_src>

<mosaic_0001>
module attributes {stable_mosaic.version = 11 : i64} {
  func.func @_rope_kernel(%arg0: i32, %arg1: memref<32x256xf32, #tpu.memory_space<vmem>>, %arg2: memref<3x256xf32, #tpu.memory_space<vmem>>, %arg3: memref<32x256xf32, #tpu.memory_space<vmem>>) attributes {dimension_semantics = [#tpu.dimension_semantics<parallel>], iteration_bounds = array<i64: 8>, scalar_prefetch = 0 : i64, scratch_operands = 0 : i64, tpu.core_type = #tpu.core_type<tc>, window_params = [{transform_indices = @transform_0, window_bounds = array<i64: 32, 256>}, {pipeline_mode = #tpu.pipeline_mode<synchronous>, transform_indices = @transform_1, window_bounds = array<i64: 3, 256>}, {transform_indices = @transform_2, window_bounds = array<i64: 32, 256>}]} {
    %c0 = arith.constant 0 : index
    %c0_0 = arith.constant 0 : index
    %0 = vector.load %arg1[%c0, %c0_0] : memref<32x256xf32, #tpu.memory_space<vmem>>, vector<32x256xf32>
    %c0_1 = arith.constant 0 : index
    %c0_2 = arith.constant 0 : index
    %1 = vector.load %arg2[%c0_1, %c0_2] : memref<3x256xf32, #tpu.memory_space<vmem>>, vector<1x256xf32>
    %c1 = arith.constant 1 : index
    %c0_3 = arith.constant 0 : index
    %2 = vector.load %arg2[%c1, %c0_3] : memref<3x256xf32, #tpu.memory_space<vmem>>, vector<1x256xf32>
    %c2 = arith.constant 2 : index
    %c0_4 = arith.constant 0 : index
    %3 = vector.load %arg2[%c2, %c0_4] : memref<3x256xf32, #tpu.memory_space<vmem>>, vector<1x256xf32>
    %c255_i32 = arith.constant 255 : i32
    %4 = tpu.dynamic_rotate %0 by %c255_i32 dim 1 : vector<32x256xf32>, i32 -> vector<32x256xf32>
    %c1_i32 = arith.constant 1 : i32
    %5 = tpu.dynamic_rotate %0 by %c1_i32 dim 1 : vector<32x256xf32>, i32 -> vector<32x256xf32>
    %6 = vector.broadcast %1 : vector<1x256xf32> to vector<32x256xf32>
    %7 = arith.mulf %0, %6 : vector<32x256xf32>
    %8 = vector.broadcast %2 : vector<1x256xf32> to vector<32x256xf32>
    %9 = arith.mulf %4, %8 : vector<32x256xf32>
    %10 = arith.addf %7, %9 : vector<32x256xf32>
    %11 = vector.broadcast %3 : vector<1x256xf32> to vector<32x256xf32>
    %12 = arith.mulf %5, %11 : vector<32x256xf32>
    %13 = arith.addf %10, %12 : vector<32x256xf32>
    %c0_5 = arith.constant 0 : index
    %c0_6 = arith.constant 0 : index
    %14 = vector.load %arg3[%c0_5, %c0_6] : memref<32x256xf32, #tpu.memory_space<vmem>>, vector<32x256xf32>
    tpu.vector_store %arg3[%c0_5, %c0_6], %13 {strides = array<i32>} : memref<32x256xf32, #tpu.memory_space<vmem>>, vector<32x256xf32>,
    return
  }
  func.func @transform_0(%arg0: i32) -> (i32, i32) {
    %c0_i32 = arith.constant 0 : i32
    %c0_i32_0 = arith.constant 0 : i32
    return %arg0, %c0_i32 : i32, i32
  }
  func.func @transform_1(%arg0: i32) -> (i32, i32) {
    %c0_i32 = arith.constant 0 : i32
    %c0_i32_0 = arith.constant 0 : i32
    %c0_i32_1 = arith.constant 0 : i32
    return %c0_i32, %c0_i32_0 : i32, i32
  }
  func.func @transform_2(%arg0: i32) -> (i32, i32) {
    %c0_i32 = arith.constant 0 : i32
    %c0_i32_0 = arith.constant 0 : i32
    return %arg0, %c0_i32 : i32, i32
  }
}

</mosaic_0001>

<bundles_post_ra>
// kernel: tpu_custom_call.1
= control target key start
LH: loop header
LB: loop body
LE: loop exit
PB: predicated region body
PF: predicated region fallthrough
CT: control target
= control target key end

     0   :  { %7 = vsyncpa [#allocation3], 0  ;;  %s884_s0 = inlined_call_operand.hbm [shape: f32[256,256], index: 0, kind: input, shape index: {}]   ;;  %s885_s1 = inlined_call_operand.hbm [shape: f32[3,256], index: 1, kind: input, shape index: {}]   ;;  %s886_s2 = inlined_call_operand.hbm [shape: f32[256,256], index: 2, kind: output, shape index: {}]  }
   0x1   :  { %9 = vsyncpa [#allocation3 + $0x1], 0 }
   0x2   :  { %10 = vsyncpa [#allocation6], 0 }
   0x3   :  { %11 = vsyncpa [#allocation4], 0 }
   0x4   :  { %13 = vsyncpa [#allocation4 + $0x1], 0  ;;  %s655_s9 = smov 0   ;;  %s657_s10 = smov 0  }
   0x5   :  { %s659_s11 = smov 0   ;;  %s661_s12 = smov 0  }
   0x6 LB: > { %s676_s13 = sadd.s32 4294967295, %s629_s12   ;;  %s422_s14 = sadd.s32 4294967294, %s629_s12   ;;  %s629_s12 = sphi %s661_s12, %s907_s12   ;;  %s625_s11 = sphi %s659_s11, %s906_s11   ;;  %s621_s10 = sphi %s657_s10, %s905_s10   ;;  %s617_s9 = sphi %s655_s9, %s904_s9  }
   0x7   : > { %s680_s15 = sadd.s32 1, %s629_s12   ;;  %s26_s16 = sadd.s32 1, %s625_s11 }
   0x8   : > { %s23_s17 = ssub.s32 %s629_s12, %s680_s15  ;;  %p33_p0 = scmp.ne.s32.totalorder %s625_s11, %s621_s10 }
   0x9   : > { %p24_p1 = scmp.eq.s32.totalorder %s23_s17, 0  ;;  %p34_p2 = scmp.eq.s32.totalorder %s629_s12, 0 }
   0xa   : > { %p39_p3 = scmp.ne.s32.totalorder %s621_s10, %s617_s9  ;;  %p888_p4 = scmp.eq.s32.totalorder %s676_s13, 0 }
   0xb   : > { %s692_s18 = scalar_select %p24_p1, %s625_s11, %s26_s16  }
   0xc   : > { %p694_p5 = por %p34_p2, %p33_p0  ;;  %p700_p6 = por %p888_p4, %p39_p3 }
   0xd   : > { %p84_p7 = scmp.eq.s32.totalorder %s676_s13, 7  ;;  %p90_p8 = scmp.eq.s32.totalorder %s422_s14, 7 }
   0xe   : > { %s892_s20 = scalar_select %p700_p6, 1, 0 }
   0xf   : > { %p423_p9 = scmp.ge.s32.totalorder %s629_s12, 1  ;;  %p97_p10 = scmp.lt.s32.totalorder %s629_s12, 9 }
  0x10   : > { %p707_p11 = por %p84_p7, %p33_p0  ;;  %p711_p12 = por %p90_p8, %p39_p3 }
  0x11   : > { %p715_p13 = pnand %p423_p9, %p97_p10  ;;  %s631_s24 = smov [#allocation5]  }
  0x12   : > { %s893_s21 = scalar_select %p707_p11, 1, 0 }
  0x13   : > { %s894_s22 = scalar_select %p711_p12, 1, 0 }
  0x14   : > { %s895_s23 = scalar_select %p715_p13, 1, 0 }
  0x15   : > { %p452_p1 = pneg %p715_p13  ;;  %s110_s25 = sshll.u32 %s631_s24, 4  ;;  %s111_s25 = int_to_ptr.vmem [resolvable:$true] %s110_s25 }
  0x16   : > { %p465_p2 = scmp.lt.s32.totalorder %s629_s12, 8  ;;  %s121_s27 = sand.u32 1, %s625_s11  }
  0x17   : > { %p724_p0 = pnand %p452_p1, %p888_p4  ;;  %s426_s29 = sshll.u32 %s121_s27, 6 }
  0x18   : > { %p731_p3 = pnand %p465_p2, %p694_p5  ;;  %s518_s30 = scalar_lea.vmem %s111_s25, 128 }
  0x19   : > { %p509_p7 = pneg %p724_p0  ;;  %p519_p8 = scmp.ne.s32.totalorder %s111_s25, %s518_s30 }
  0x1a   : > { %p526_p12 = scmp.lt.s32.totalorder %s111_s25, %s111_s25  ;;  %p527_p11 = scmp.lt.s32.totalorder %s518_s30, %s518_s30 }
  0x1b   : > { %p521_p9 = pnand %p519_p8, %p509_p7 }
  0x1c   : > { %p528_p1 = por %p527_p11, %p526_p12 }
  0x1d   : > { %p522_p10 = pneg %p521_p9 }
  0x1f   : > { %p529_p4 = pnand %p528_p1, %p522_p10 }
  0x21   : > { %532 = shalt.err (!%p529_p4)
}
  0x22   : > { %455 = dma.hbm_to_vmem [thread:$0]  (!%p724_p0), %s885_s1, 128, %s111_s25, [#allocation6]  }
  0x23   : > { %s441_s5 = sshll.u32 %s629_s12, 10  ;;  %s125_s6 = scalar_lea.vmem [#allocation2], %s426_s29 }
  0x24   : > { %s133_s7 = sshll.u32 %s125_s6, 4  ;;  %s746_s16 = scalar_lea.hbm %s884_s0, %s441_s5  ;;  %s748_s7 = int_to_ptr.vmem [resolvable:$true] %s133_s7 }
  0x25   : > { %s750_s17 = scalar_lea.sflag [#allocation3], %s121_s27  ;;  %s533_s19 = scalar_lea.hbm %s746_s16, 1024 }
  0x26   : > { %p534_p4 = scmp.ne.s32.totalorder %s746_s16, %s533_s19  ;;  %p535_p5 = pneg %p731_p3 }
  0x27   : > { %s538_s26 = scalar_lea.hbm %s884_s0, 8192  ;;  %p539_p2 = scmp.lt.s32.totalorder %s746_s16, %s884_s0 }
  0x28   : > { %p536_p11 = pnand %p535_p5, %p534_p4  ;;  %p540_p0 = scmp.lt.s32.totalorder %s538_s26, %s533_s19 }
  0x2a   : > { %p537_p12 = pneg %p536_p11  ;;  %p541_p7 = por %p540_p0, %p539_p2 }
  0x2c   : > { %p542_p8 = pnand %p541_p7, %p537_p12 }
  0x2e   : > { %545 = shalt.err (!%p542_p8)
}
  0x2f   : > { %s546_s27 = scalar_lea.vmem %s748_s7, 1024  ;;  %s632_s3 = smov [#allocation2]  }
  0x30   : > { %p547_p9 = scmp.ne.s32.totalorder %s748_s7, %s546_s27  ;;  %s551_s4 = sshll.u32 %s632_s3, 4  ;;  %s552_s4 = int_to_ptr.vmem [resolvable:$false] %s551_s4 }
  0x31   : > { %s553_s5 = scalar_lea.vmem %s552_s4, 2048  ;;  %p554_p4 = scmp.lt.s32.totalorder %s748_s7, %s552_s4 }
  0x32   : > { %p549_p10 = pnand %p547_p9, %p535_p5  ;;  %p555_p11 = scmp.lt.s32.totalorder %s553_s5, %s546_s27 }
  0x34   : > { %p550_p1 = pneg %p549_p10  ;;  %p556_p6 = por %p555_p11, %p554_p4 }
  0x36   : > { %p557_p13 = pnand %p556_p6, %p550_p1 }
  0x38   : > { %560 = shalt.err (!%p557_p13)
}
  0x39   : > { %s633_s6 = smov 256   ;;  %s634_s8 = smov 16  }
  0x3a   : > { %459 = dma.hbm_to_vmem [thread:$0]  (!%p731_p3), %s746_s16, 1024, %s748_s7, %s750_s17, %s633_s6, %s633_s6, %s634_s8  }
  0x3b   : > { %p898_p5 = scmp.ne.s32.totalorder %s895_s23, 0 }
  0x3c   : > { %s774_s14 = sand.u32 (!%p898_p5), 1, %s621_s10   ;;  %p899_p6 = scmp.ne.s32.totalorder (!%p898_p5), %s892_s20, 0 }
  0x3d   : > { %145 = sbr.rel (%p898_p5) target bundleno = 235 (0xeb), region = 28  ;;  %s431_s19 = sshll.u32 (!%p898_p5), %s774_s14, 6 }
  0x3e   : > { %s148_s24 = scalar_lea.sflag (!%p898_p5), [#allocation3], %s774_s14  ;;  %s151_s25 = scalar_lea.vmem (!%p898_p5), [#allocation2], %s431_s19 }
  0x42   : > { %604 = dma.done.wait (%p899_p6), %s148_s24, 1024  }
  0x43   : > { %606 = vsyncadd (%p899_p6), %s148_s24, 4294966272  ;;  %p900_p13 = scmp.eq.s32.totalorder %s676_s13, 0 }
  0x45   : > { %608 = dma.done.wait (%p900_p13), [#allocation6], 128   ;;  %p901_p3 = pmov %p900_p13 }
  0x46   : > { %v788_v0 = vld [vmem:[%s151_s25 + $0x20] sm:$0xff]  ;;  %s635_s23 = smov 127   ;;  %v791_v2 = vld [vmem:[%s151_s25 + $0x30] sm:$0xff]  ;;  %v181_v4 = vld [vmem:[%s151_s25 + $0x18] sm:$0xff]  ;;  %s636_s20 = smov 1   ;;  %v207_v10 = vlaneseq }
  0x47   : > { %610 = vsyncadd (%p901_p3), [#allocation6], 4294967168  ;;  %v178_v1 = vld [vmem:[%s151_s25] sm:$0xff]  ;;  %195 = vrot.lane.b32.xlu1 %v788_v0, %s635_s23  ;;  %v180_v3 = vld [vmem:[%s151_s25 + $0x10] sm:$0xff]  ;;  %s443_s28 = sshll.u32 %s676_s13, 10  ;;  %s175_s7 = scalar_lea.vmem [#allocation7], %s431_s19 }
  0x48   : > { %191 = vrot.lane.b32.xlu0 %v178_v1, %s635_s23  ;;  %v179_v5 = vld [vmem:[%s151_s25 + $0x8] sm:$0xff]  ;;  %v185_v6 = vld [vmem:[%s151_s25 + $0x38] sm:$0xff]  ;;  %v245_v13 = vshrl.u32 %v207_v10, 7  ;;  %v796_v16 = vand.u32 127, %v207_v10  ;;  %s339_s16 = sshll.u32 %s175_s7, 4  ;;  %s840_s26 = scalar_lea.hbm %s886_s2, %s443_s28  ;;  %s842_s16 = int_to_ptr.vmem [resolvable:$true] %s339_s16 }
  0x49   : > { %v183_v7 = vld [vmem:[%s151_s25 + $0x28] sm:$0xff]  ;;  %v186_v19 = vld [vmem:[#allocation5] ss:$4 sm:$0x3]  ;;  %s325_s29 = scalar_lea.sflag [#allocation4], %s774_s14  ;;  %s561_s30 = scalar_lea.vmem %s842_s16, 1024 }
  0x4a   : > { %v246_v17 = vsub.s32 0, %v245_v13  ;;  %v250_v18 = vsub.s32 1, %v245_v13  ;;  %v188_v20 = vld [vmem:[#allocation5 + $0x1] ss:$4 sm:$0x3]  ;;  %vm209_vm0 = vcmp.lt.s32.totalorder %v796_v16, 127  ;;  %p562_p12 = scmp.ne.s32.totalorder %s842_s16, %s561_s30 }
  0x4b   : > { %197 = vrot.lane.b32.xlu1 %v791_v2, %s635_s23  ;;  %v190_v41 = vld [vmem:[#allocation5 + $0x2] ss:$4 sm:$0x3]  ;;  %vm234_vm1 = vcmp.lt.s32.totalorder %v796_v16, 1  ;;  %p902_p2 = scmp.ne.s32.totalorder %s893_s21, 0  ;;  %s637_s27 = smov [#allocation7]  }
  0x4c   : > { %193 = vrot.lane.b32.xlu0 %v180_v3, %s635_s23  ;;  %v247_v23 = vrot.slane %v186_v19, %v246_v17  ;;  %v251_v24 = vrot.slane %v186_v19, %v250_v18  ;;  %v266_v25 = vrot.slane %v188_v20, %v246_v17  ;;  %v270_v26 = vrot.slane %v188_v20, %v250_v18  ;;  %s565_s3 = sshll.u32 %s637_s27, 4  ;;  %s566_s3 = int_to_ptr.vmem [resolvable:$false] %s565_s3 }
  0x4d   : > { %v293_v52 = vrot.slane %v190_v41, %v246_v17  ;;  %v297_v53 = vrot.slane %v190_v41, %v250_v18  ;;  %p563_p0 = pnand %p562_p12, %p902_p2  ;;  %s567_s4 = scalar_lea.vmem %s566_s3, 2048 }
  0x4e   : > { %v254_v33 = vmul.f32 %v247_v23, %v178_v1  ;;  %v256_v34 = vmul.f32 %v247_v23, %v180_v3  ;;  %v257_v35 = vmul.f32 %v251_v24, %v181_v4  ;;  %v255_v36 = vmul.f32 %v251_v24, %v179_v5  ;;  %p568_p8 = scmp.lt.s32.totalorder %s842_s16, %s566_s3  ;;  %p569_p9 = scmp.lt.s32.totalorder %s567_s4, %s561_s30 }
  0x4f   : > { %201 = vrot.lane.b32.xlu1 %v181_v4, %s635_s23  ;;  %v258_v48 = vmul.f32 %v247_v23, %v788_v0  ;;  %v260_v49 = vmul.f32 %v247_v23, %v791_v2  ;;  %v261_v50 = vmul.f32 %v251_v24, %v185_v6  ;;  %v259_v51 = vmul.f32 %v251_v24, %v183_v7  ;;  %p564_p7 = pneg %p563_p0 }
  0x50   : > { %199 = vrot.lane.b32.xlu0 %v179_v5, %s635_s23  ;;  %p570_p10 = por %p569_p9, %p568_p8 }
  0x52   : > { %p571_p1 = pnand %p570_p10, %p564_p7 }
  0x53   : > { %205 = vrot.lane.b32.xlu1 %v185_v6, %s635_s23 }
  0x54   : > { %203 = vrot.lane.b32.xlu0 %v183_v7, %s635_s23 }
  0x57   : > { %220 = vrot.lane.b32.xlu1 %v180_v3, %s636_s20 }
  0x58   : > { %218 = vrot.lane.b32.xlu0 %v178_v1, %s636_s20 }
  0x5b   : > { %224 = vrot.lane.b32.xlu1 %v791_v2, %s636_s20 }
  0x5c   : > { %222 = vrot.lane.b32.xlu0 %v788_v0, %s636_s20 }
  0x5f   : > { %228 = vrot.lane.b32.xlu1 %v181_v4, %s636_s20 }
  0x60   : > { %226 = vrot.lane.b32.xlu0 %v179_v5, %s636_s20 }
  0x63   : > { %232 = vrot.lane.b32.xlu1 %v185_v6, %s636_s20 }
  0x64   : > { %230 = vrot.lane.b32.xlu0 %v183_v7, %s636_s20 }
  0xb9   : > { %v196_v8 = vpop.permute.xlu1 %195 }
  0xba   : > { %v192_v9 = vpop.permute.xlu0 %191 }
  0xbd   : > { %v198_v11 = vpop.permute.xlu1 %197 }
  0xbe   : > { %v194_v12 = vpop.permute.xlu0 %193 }
  0xc1   : > { %v202_v14 = vpop.permute.xlu1 %201 }
  0xc2   : > { %v200_v15 = vpop.permute.xlu0 %199  ;;  %v211_v27 = vsel %vm209_vm0, %v194_v12, %v202_v14  ;;  %v215_v28 = vsel %vm209_vm0, %v202_v14, %v194_v12 }
  0xc3   : > { %v210_v29 = vsel %vm209_vm0, %v192_v9, %v200_v15  ;;  %v214_v30 = vsel %vm209_vm0, %v200_v15, %v192_v9  ;;  %v275_v37 = vmul.f32 %v266_v25, %v211_v27  ;;  %v276_v38 = vmul.f32 %v270_v26, %v215_v28 }
  0xc4   : > { %v273_v39 = vmul.f32 %v266_v25, %v210_v29  ;;  %v274_v40 = vmul.f32 %v270_v26, %v214_v30 }
  0xc5   : > { %v206_v21 = vpop.permute.xlu1 %205  ;;  %v283_v58 = vadd.f32 %v275_v37, %v256_v34  ;;  %v284_v59 = vadd.f32 %v276_v38, %v257_v35 }
  0xc6   : > { %v204_v22 = vpop.permute.xlu0 %203  ;;  %v213_v42 = vsel %vm209_vm0, %v198_v11, %v206_v21  ;;  %v217_v43 = vsel %vm209_vm0, %v206_v21, %v198_v11  ;;  %v281_v60 = vadd.f32 %v273_v39, %v254_v33  ;;  %v282_v61 = vadd.f32 %v274_v40, %v255_v36 }
  0xc7   : > { %v212_v44 = vsel %vm209_vm0, %v196_v8, %v204_v22  ;;  %v216_v45 = vsel %vm209_vm0, %v204_v22, %v196_v8  ;;  %v279_v54 = vmul.f32 %v266_v25, %v213_v42  ;;  %v280_v55 = vmul.f32 %v270_v26, %v217_v43 }
  0xc8   : > { %v277_v56 = vmul.f32 %v266_v25, %v212_v44  ;;  %v278_v57 = vmul.f32 %v270_v26, %v216_v45 }
  0xc9   : > { %v221_v31 = vpop.permute.xlu1 %220  ;;  %v287_v8 = vadd.f32 %v279_v54, %v260_v49  ;;  %v288_v9 = vadd.f32 %v280_v55, %v261_v50 }
  0xca   : > { %v219_v32 = vpop.permute.xlu0 %218  ;;  %v285_v10 = vadd.f32 %v277_v56, %v258_v48  ;;  %v286_v11 = vadd.f32 %v278_v57, %v259_v51 }
  0xcd   : > { %v225_v46 = vpop.permute.xlu1 %224 }
  0xce   : > { %v223_v47 = vpop.permute.xlu0 %222 }
  0xd1   : > { %v229_v62 = vpop.permute.xlu1 %228 }
  0xd2   : > { %v227_v63 = vpop.permute.xlu0 %226  ;;  %v236_v0 = vsel %vm234_vm1, %v221_v31, %v229_v62  ;;  %v240_v1 = vsel %vm234_vm1, %v229_v62, %v221_v31 }
  0xd3   : > { %v235_v2 = vsel %vm234_vm1, %v219_v32, %v227_v63  ;;  %v239_v3 = vsel %vm234_vm1, %v227_v63, %v219_v32  ;;  %v302_v4 = vmul.f32 %v293_v52, %v240_v1  ;;  %v303_v5 = vmul.f32 %v297_v53, %v236_v0 }
  0xd4   : > { %v300_v6 = vmul.f32 %v293_v52, %v239_v3  ;;  %v301_v7 = vmul.f32 %v297_v53, %v235_v2 }
  0xd5   : > { %v310_v12 = vadd.f32 %v302_v4, %v283_v58  ;;  %v311_v13 = vadd.f32 %v303_v5, %v284_v59  ;;  %v233_v17 = vpop.permute.xlu1 %232 }
  0xd6   : > { %v308_v14 = vadd.f32 %v300_v6, %v281_v60  ;;  %v309_v15 = vadd.f32 %v301_v7, %v282_v61  ;;  %v231_v18 = vpop.permute.xlu0 %230  ;;  %v238_v19 = vsel %vm234_vm1, %v225_v46, %v233_v17  ;;  %v242_v20 = vsel %vm234_vm1, %v233_v17, %v225_v46 }
  0xd7   : > { %v237_v21 = vsel %vm234_vm1, %v223_v47, %v231_v18  ;;  %v241_v22 = vsel %vm234_vm1, %v231_v18, %v223_v47  ;;  %318 = vst [vmem:[%s175_s7 + $0x10] sm:$0xff] %v310_v12  ;;  %319 = vst [vmem:[%s175_s7 + $0x18] sm:$0xff] %v311_v13  ;;  %v306_v23 = vmul.f32 %v293_v52, %v242_v20 }
  0xd8   : > { %316 = vst [vmem:[%s175_s7] sm:$0xff] %v308_v14  ;;  %317 = vst [vmem:[%s175_s7 + $0x8] sm:$0xff] %v309_v15  ;;  %v307_v24 = vmul.f32 %v297_v53, %v238_v19  ;;  %v304_v25 = vmul.f32 %v293_v52, %v241_v22  ;;  %v305_v26 = vmul.f32 %v297_v53, %v237_v21 }
  0xd9   : > { %v314_v16 = vadd.f32 %v306_v23, %v287_v8 }
  0xda   : > { %v315_v27 = vadd.f32 %v307_v24, %v288_v9  ;;  %v312_v28 = vadd.f32 %v304_v25, %v285_v10  ;;  %v313_v29 = vadd.f32 %v305_v26, %v286_v11 }
  0xdb   : > { %322 = vst [vmem:[%s175_s7 + $0x30] sm:$0xff] %v314_v16 }
  0xdc   : > { %323 = vst [vmem:[%s175_s7 + $0x38] sm:$0xff] %v315_v27  ;;  %320 = vst [vmem:[%s175_s7 + $0x20] sm:$0xff] %v312_v28 }
  0xdd   : > { %321 = vst [vmem:[%s175_s7 + $0x28] sm:$0xff] %v313_v29 }
  0xde   : > { %574 = shalt.err (!%p571_p1)
}
  0xdf   : > { %s575_s5 = scalar_lea.hbm %s840_s26, 1024  ;;  %s579_s19 = scalar_lea.hbm %s886_s2, 8192 }
  0xe0   : > { %p576_p4 = scmp.ne.s32.totalorder %s840_s26, %s575_s5  ;;  %p580_p6 = scmp.lt.s32.totalorder %s840_s26, %s886_s2 }
  0xe1   : > { %p581_p13 = scmp.lt.s32.totalorder %s579_s19, %s575_s5 }
  0xe2   : > { %p577_p11 = pnand %p576_p4, %p902_p2 }
  0xe3   : > { %p582_p3 = por %p581_p13, %p580_p6 }
  0xe4   : > { %p578_p5 = pneg %p577_p11 }
  0xe6   : > { %p583_p12 = pnand %p582_p3, %p578_p5 }
  0xe8   : > { %586 = shalt.err (!%p583_p12)
}
  0xe9   : > { %s638_s23 = smov 256   ;;  %s639_s20 = smov 16  }
  0xea   : > { %450 = dma.vmem_to_hbm [thread:$0]  (%p902_p2), %s842_s16, 1024, %s840_s26, %s325_s29, %s638_s23, %s638_s23, %s639_s20  }
  0xeb PF: > { %p467_p0 = scmp.ge.s32.totalorder %s629_s12, 2  ;;  %s354_s28 = sand.u32 1, %s617_s9  }
  0xec   : > { %p903_p7 = scmp.ne.s32.totalorder %s894_s22, 0  ;;  %s355_s7 = scalar_lea.sflag [#allocation4], %s354_s28 }
  0xee   : > { %p461_p8 = pnand %p467_p0, %p903_p7 }
  0xf0   : > { %p462_p9 = pneg %p461_p8 }
  0xf2   : > { %612 = dma.done.wait (%p462_p9), %s355_s7, 1024  }
  0xf3   : > { %614 = vsyncadd (%p462_p9), %s355_s7, 4294966272  ;;  %p16_p10 = scmp.ge.s32.totalorder %s680_s15, 10   ;;  %s904_s9 = smov %s621_s10 }
  0xf4   : > { %s905_s10 = smov %s625_s11  ;;  %s906_s11 = smov %s692_s18 }
  0xf5   : > { %s907_s12 = smov %s680_s15  ;;  %18 = sbr.rel (!%p16_p10) target bundleno = 6 (0x6), region = 79 }
  0xfa   :  { %360 = vsyncpa [#allocation3], 1 }
  0xfb   :  { %362 = vsyncpa [#allocation3 + $0x1], 1 }
  0xfc   :  { %363 = vsyncpa [#allocation6], 1 }
  0xfd   :  { %364 = vsyncpa [#allocation4], 1 }
  0xfe   :  { %366 = vsyncpa [#allocation4 + $0x1], 1 }

</bundles_post_ra>
